<compile_context>
chip_gen: v6e
topology: v6e:2x2x1
jax: 0.10.0
libtpu: 0.0.40
codegen_flags: <defaults>
</compile_context>

<pallas_src>
import functools
import math

import jax
import jax.numpy as jnp
from jax import lax
from jax.experimental import pallas as pl
from jax.experimental.pallas import tpu as pltpu

NEG_INF = -1e30  # large negative; exp() underflows to exactly 0 after softmax


def _mhsa_kernel(x_ref, wqkv_ref, bqkv_ref, bias_ref, wo_ref, bo_ref, o_ref,
                 *, n_head, d_head, seq_len, batch_block, is_causal):
    """One grid step == batch_block sequences.  Matmul operands bf16, accum f32."""
    D = n_head * d_head
    L = seq_len
    TB = batch_block
    M = TB * L

    # ---- fused QKV projection over all TB*L rows (fills the MXU M dim) ----
    qkv = jnp.dot(x_ref[...], wqkv_ref[...],
                  preferred_element_type=jnp.float32)              # (M, 3D) f32
    qkv = qkv + bqkv_ref[...]

    # ---- additive score bias: pre-scaled relative PE (+ in-kernel causal) ----
    bias = bias_ref[...]                                           # (H, L, L) f32
    if is_causal:
        row = lax.broadcasted_iota(jnp.int32, (L, L), 0)
        col = lax.broadcasted_iota(jnp.int32, (L, L), 1)
        causal = jnp.where(row >= col, 0.0, NEG_INF).astype(jnp.float32)
        bias = bias + causal[None]

    out = jnp.zeros((M, D), jnp.float32)
    for h in range(n_head):                       # small static unroll; per-head
        # head-major column layout: [Q heads | K heads | V heads]
        q = qkv[:, h * d_head:(h + 1) * d_head]
        k = qkv[:, D + h * d_head:D + (h + 1) * d_head]
        v = qkv[:, 2 * D + h * d_head:2 * D + (h + 1) * d_head]
        q = q.reshape(TB, L, d_head).astype(jnp.bfloat16)
        k = k.reshape(TB, L, d_head).astype(jnp.bfloat16)
        v = v.reshape(TB, L, d_head).astype(jnp.bfloat16)

        # scores: q already carries the 1/sqrt(d_head) fold from the wrapper
        s = jnp.einsum('bqd,bkd->bqk', q, k,
                       preferred_element_type=jnp.float32)         # (TB, L, L)
        s = s + bias[h]

        m = jnp.max(s, axis=-1, keepdims=True)                     # f32 softmax
        p = jnp.exp(s - m)
        attn = p * pl.reciprocal(jnp.sum(p, axis=-1, keepdims=True), approx=True)

        ctx = jnp.einsum('bqk,bkd->bqd', attn.astype(jnp.bfloat16), v,
                         preferred_element_type=jnp.float32)       # (TB, L, dh)

        # fold the output projection per head: out += ctx_h @ W_o[h]
        # (replaces concat + column-offset stores; same math, no relayout pass)
        out = out + jnp.dot(ctx.reshape(M, d_head).astype(jnp.bfloat16),
                            wo_ref[h],
                            preferred_element_type=jnp.float32)

    out = out + bo_ref[...]
    o_ref[...] = out.astype(o_ref.dtype)


def multi_head_self_attention(x, wqkv_w, wqkv_b, wo_w, wo_b, pos_bias,
                              n_head, is_causal=True, batch_block=None):
    """x: (B, L, d_model) f32.
    wqkv_w: (3*d_model, d_model), wqkv_b: (3*d_model,)   [PyTorch Linear layout]
    wo_w:   (d_model, d_model),   wo_b:   (d_model,)
    pos_bias: (2*L - 1, n_head) relative position-bias parameter.
    Returns (B, L, d_model) matching the PyTorch module forward."""
    B, L, d_model = x.shape
    H = n_head
    d_head = d_model // n_head
    inv_scale = 1.0 / math.sqrt(d_head)

    # --- batch blocking: feed >= ~256 rows per step to the MXU when possible ---
    if batch_block is None:
        tb = min(B, max(1, -(-256 // L)))          # ceil(256 / L), capped at B
        while B % tb:
            tb -= 1
    else:
        tb = batch_block
    grid = (B // tb,)
    M = tb * L

    # ---- parameter layout plumbing (one-time, wrapper-side) ----
    # PyTorch output feature j = h*3*d_head + s*d_head + e  (s: 0=q, 1=k, 2=v).
    # Rearrange columns to [all-Q heads | all-K heads | all-V heads], head-major,
    # folding 1/sqrt(d_head) into the Q columns and Q bias.
    wt = wqkv_w.T.reshape(d_model, H, 3, d_head)                   # [d, h, s, e]
    wt = wt.at[:, :, 0, :].multiply(inv_scale)
    wqkv2 = jnp.transpose(wt, (0, 2, 1, 3)).reshape(d_model, 3 * d_model)
    bt = wqkv_b.reshape(H, 3, d_head)
    bt = bt.at[:, 0, :].multiply(inv_scale)
    bqkv2 = jnp.transpose(bt, (1, 0, 2)).reshape(1, 3 * d_model)

    wo3 = wo_w.T.reshape(H, d_head, d_model)        # head-leading W_o row blocks
    bo2 = wo_b.reshape(1, d_model)

    # Relative-position bias per head, pre-scaled (causal mask added in-kernel).
    idx = jnp.arange(L)[:, None] - jnp.arange(L)[None, :] + (L - 1)     # (L, L)
    bias = (jnp.transpose(pos_bias[idx], (2, 0, 1)) * inv_scale
            ).astype(jnp.float32)                                       # (H, L, L)

    # bf16 MXU operands (f32 accumulation inside the kernel); biases stay f32.
    x_flat = x.reshape(B * L, d_model).astype(jnp.bfloat16)
    wqkv2 = wqkv2.astype(jnp.bfloat16)
    wo3 = wo3.astype(jnp.bfloat16)
    bqkv2 = bqkv2.astype(jnp.float32)
    bo2 = bo2.astype(jnp.float32)

    kernel = functools.partial(_mhsa_kernel, n_head=H, d_head=d_head,
                               seq_len=L, batch_block=tb, is_causal=is_causal)

    out = pl.pallas_call(
        kernel,
        out_shape=jax.ShapeDtypeStruct((B * L, d_model), jnp.float32),
        grid_spec=pltpu.PrefetchScalarGridSpec(
            num_scalar_prefetch=0,
            grid=grid,
            in_specs=[
                pl.BlockSpec((M, d_model), lambda i: (i, 0)),              # x rows
                pl.BlockSpec((d_model, 3 * d_model), lambda i: (0, 0)),    # W_qkv
                pl.BlockSpec((1, 3 * d_model), lambda i: (0, 0)),          # b_qkv
                pl.BlockSpec((H, L, L), lambda i: (0, 0, 0)),              # rel-PE
                pl.BlockSpec((H, d_head, d_model), lambda i: (0, 0, 0)),   # W_o
                pl.BlockSpec((1, d_model), lambda i: (0, 0)),              # b_o
            ],
            out_specs=pl.BlockSpec((M, d_model), lambda i: (i, 0)),
        ),
        compiler_params=pltpu.CompilerParams(
            dimension_semantics=("parallel",),
            vmem_limit_bytes=32 * 1024 * 1024,
        ),
    )(x_flat, wqkv2, bqkv2, bias, wo3, bo2)
    return out.reshape(B, L, d_model)


def _reference(x, wqkv_w, wqkv_b, wo_w, wo_b, pos_bias, n_head, is_causal=True):
    """Pure-JAX replica of the PyTorch forward (use_relative_pe=True path)."""
    B, L, d_model = x.shape
    d_head = d_model // n_head
    qkv = x @ wqkv_w.T + wqkv_b                                   # (B, L, 3*d_model)
    qkv = qkv.reshape(B, L, n_head, 3 * d_head).transpose(0, 2, 1, 3)
    q = qkv[..., :d_head]
    k = qkv[..., d_head:2 * d_head]
    v = qkv[..., 2 * d_head:]
    dots = jnp.einsum('bhqe,bhke->bhqk', q, k)
    idx = jnp.arange(L)[:, None] - jnp.arange(L)[None, :] + (L - 1)
    b_pos = jnp.transpose(pos_bias[idx], (2, 0, 1))[None]         # (1, H, L, L)
    values = (dots + b_pos) / math.sqrt(d_head)
    if is_causal:
        mask = jnp.tril(jnp.ones((L, L), dtype=bool))
        values = values + jnp.where(mask, 0.0, -jnp.inf)[None, None]
    attn = jax.nn.softmax(values, axis=-1)
    att_vals = jnp.einsum('bhqk,bhke->bhqe', attn, v)
    att_vals = att_vals.transpose(0, 2, 1, 3).reshape(B, L, d_model)
    return att_vals @ wo_w.T + wo_b


if __name__ == "__main__":
    # Small deterministic example consistent with the module:
    # batch=2, seq L=8, d_model=32, n_head=4 (d_head=8), use_relative_pe=True,
    # is_causal=True.
    B, L, d_model, n_head = 2, 8, 32, 4

    key = jax.random.PRNGKey(0)
    k1, k2, k3, k4, k5, k6 = jax.random.split(key, 6)
    x = jax.random.normal(k1, (B, L, d_model), dtype=jnp.float32)

    # Xavier-uniform-style weights; biases / position_bias are zero at module
    # init, but small random values exercise the full path.
    lim_qkv = math.sqrt(6.0 / (d_model + 3 * d_model))
    wqkv_w = jax.random.uniform(k2, (3 * d_model, d_model), jnp.float32,
                                -lim_qkv, lim_qkv)
    wqkv_b = 0.1 * jax.random.normal(k3, (3 * d_model,), dtype=jnp.float32)
    lim_o = math.sqrt(6.0 / (2 * d_model))
    wo_w = jax.random.uniform(k4, (d_model, d_model), jnp.float32, -lim_o, lim_o)
    wo_b = 0.1 * jax.random.normal(k5, (d_model,), dtype=jnp.float32)
    pos_bias = 0.1 * jax.random.normal(k6, (2 * L - 1, n_head), dtype=jnp.float32)
    # TODO(synk): nn.Dropout is never applied on the use_relative_pe forward
    # path of the module (and is identity in eval mode), so it is not modeled.

    out = multi_head_self_attention(x, wqkv_w, wqkv_b, wo_w, wo_b, pos_bias, n_head)
    out = jax.block_until_ready(out)

    ref = jax.block_until_ready(
        _reference(x, wqkv_w, wqkv_b, wo_w, wo_b, pos_bias, n_head))

    assert out.shape == (B, L, d_model), out.shape
    # Tolerance covers bf16 MXU operands in the kernel and default-precision
    # (bf16-operand) matmuls in the XLA reference.
    assert jnp.allclose(out, ref, atol=3e-2, rtol=3e-2), float(
        jnp.max(jnp.abs(out - ref)))

    print("KERNEL_OK")
</pallas_src>

<mosaic_0001>
module attributes {stable_mosaic.version = 11 : i64} {
  func.func @_mhsa_kernel(%arg0: i32, %arg1: memref<16x32xbf16, #tpu.memory_space<vmem>>, %arg2: memref<32x96xbf16, #tpu.memory_space<vmem>>, %arg3: memref<1x96xf32, #tpu.memory_space<vmem>>, %arg4: memref<4x8x8xf32, #tpu.memory_space<vmem>>, %arg5: memref<4x8x32xbf16, #tpu.memory_space<vmem>>, %arg6: memref<1x32xf32, #tpu.memory_space<vmem>>, %arg7: memref<16x32xf32, #tpu.memory_space<vmem>>) attributes {dimension_semantics = [#tpu.dimension_semantics<parallel>], iteration_bounds = array<i64: 1>, scalar_prefetch = 0 : i64, scratch_operands = 0 : i64, tpu.core_type = #tpu.core_type<tc>, window_params = [{transform_indices = @transform_0, window_bounds = array<i64: 16, 32>}, {pipeline_mode = #tpu.pipeline_mode<synchronous>, transform_indices = @transform_1, window_bounds = array<i64: 32, 96>}, {pipeline_mode = #tpu.pipeline_mode<synchronous>, transform_indices = @transform_2, window_bounds = array<i64: 1, 96>}, {pipeline_mode = #tpu.pipeline_mode<synchronous>, transform_indices = @transform_3, window_bounds = array<i64: 4, 8, 8>}, {pipeline_mode = #tpu.pipeline_mode<synchronous>, transform_indices = @transform_4, window_bounds = array<i64: 4, 8, 32>}, {pipeline_mode = #tpu.pipeline_mode<synchronous>, transform_indices = @transform_5, window_bounds = array<i64: 1, 32>}, {transform_indices = @transform_6, window_bounds = array<i64: 16, 32>}]} {
    %c0 = arith.constant 0 : index
    %c0_0 = arith.constant 0 : index
    %0 = vector.load %arg1[%c0, %c0_0] : memref<16x32xbf16, #tpu.memory_space<vmem>>, vector<16x32xbf16>
    %c0_1 = arith.constant 0 : index
    %c0_2 = arith.constant 0 : index
    %1 = vector.load %arg2[%c0_1, %c0_2] : memref<32x96xbf16, #tpu.memory_space<vmem>>, vector<32x96xbf16>
    %cst = arith.constant dense<0.000000e+00> : vector<16x96xf32>
    %2 = tpu.matmul %0, %1, %cst {dimension_numbers = #tpu.dot_dimension_numbers<[1], [0], [0], [1], [0, 0, 1, 1], [], []>} : vector<16x32xbf16>, vector<32x96xbf16>, vector<16x96xf32> -> vector<16x96xf32>
    %c0_3 = arith.constant 0 : index
    %c0_4 = arith.constant 0 : index
    %3 = vector.load %arg3[%c0_3, %c0_4] : memref<1x96xf32, #tpu.memory_space<vmem>>, vector<1x96xf32>
    %4 = vector.broadcast %3 : vector<1x96xf32> to vector<16x96xf32>
    %5 = arith.addf %2, %4 : vector<16x96xf32>
    %c0_5 = arith.constant 0 : index
    %c0_6 = arith.constant 0 : index
    %c0_7 = arith.constant 0 : index
    %6 = vector.load %arg4[%c0_5, %c0_6, %c0_7] : memref<4x8x8xf32, #tpu.memory_space<vmem>>, vector<4x8x8xf32>
    %7 = tpu.iota {dimensions = array<i32: 0>} : vector<8x8xi32>
    %8 = tpu.iota {dimensions = array<i32: 1>} : vector<8x8xi32>
    %9 = arith.cmpi sge, %7, %8 : vector<8x8xi32>
    %cst_8 = arith.constant 0.000000e+00 : f32
    %cst_9 = arith.constant -1.000000e+30 : f32
    %10 = vector.broadcast %cst_8 : f32 to vector<8x8xf32>
    %11 = vector.broadcast %cst_9 : f32 to vector<8x8xf32>
    %12 = arith.select %9, %10, %11 : vector<8x8xi1>, vector<8x8xf32>
    %13 = vector.shape_cast %12 : vector<8x8xf32> to vector<1x8x8xf32>
    %14 = vector.broadcast %13 : vector<1x8x8xf32> to vector<4x8x8xf32>
    %15 = arith.addf %6, %14 : vector<4x8x8xf32>
    %cst_10 = arith.constant 0.000000e+00 : f32
    %16 = vector.broadcast %cst_10 : f32 to vector<16x32xf32>
    %17 = vector.extract_strided_slice %5 {offsets = [0, 0], sizes = [16, 8], strides = [1, 1]} : vector<16x96xf32> to vector<16x8xf32>
    %18 = vector.extract_strided_slice %5 {offsets = [0, 32], sizes = [16, 8], strides = [1, 1]} : vector<16x96xf32> to vector<16x8xf32>
    %19 = vector.extract_strided_slice %5 {offsets = [0, 64], sizes = [16, 8], strides = [1, 1]} : vector<16x96xf32> to vector<16x8xf32>
    %20 = vector.shape_cast %17 : vector<16x8xf32> to vector<2x8x8xf32>
    %21 = arith.truncf %20 : vector<2x8x8xf32> to vector<2x8x8xbf16>
    %22 = vector.shape_cast %18 : vector<16x8xf32> to vector<2x8x8xf32>
    %23 = arith.truncf %22 : vector<2x8x8xf32> to vector<2x8x8xbf16>
    %24 = vector.shape_cast %19 : vector<16x8xf32> to vector<2x8x8xf32>
    %25 = arith.truncf %24 : vector<2x8x8xf32> to vector<2x8x8xbf16>
    "tpu.trace_start"() <{level = 10 : i32, message = "bqd,bkd->bqk"}> : () -> ()
    %cst_11 = arith.constant dense<0.000000e+00> : vector<2x8x8xf32>
    %26 = tpu.matmul %21, %23, %cst_11 {dimension_numbers = #tpu.dot_dimension_numbers<[2], [2], [1], [1], [0, 0, 0, 1, 1, 1], [0], [0]>} : vector<2x8x8xbf16>, vector<2x8x8xbf16>, vector<2x8x8xf32> -> vector<2x8x8xf32>
    "tpu.trace_stop"() : () -> ()
    %27 = vector.extract_strided_slice %15 {offsets = [0, 0, 0], sizes = [1, 8, 8], strides = [1, 1, 1]} : vector<4x8x8xf32> to vector<1x8x8xf32>
    %28 = vector.shape_cast %27 : vector<1x8x8xf32> to vector<8x8xf32>
    %29 = vector.shape_cast %28 : vector<8x8xf32> to vector<1x8x8xf32>
    %30 = vector.broadcast %29 : vector<1x8x8xf32> to vector<2x8x8xf32>
    %31 = arith.addf %26, %30 : vector<2x8x8xf32>
    %cst_12 = arith.constant dense<0xFF800000> : vector<2x8xf32>
    %32 = vector.multi_reduction <maximumf>, %31, %cst_12 [2] : vector<2x8x8xf32> to vector<2x8xf32>
    %33 = vector.shape_cast %32 : vector<2x8xf32> to vector<2x8x1xf32>
    %34 = vector.broadcast %33 : vector<2x8x1xf32> to vector<2x8x8xf32>
    %35 = arith.subf %31, %34 : vector<2x8x8xf32>
    %36 = math.exp %35 : vector<2x8x8xf32>
    %cst_13 = arith.constant dense<0.000000e+00> : vector<2x8xf32>
    %37 = vector.multi_reduction <add>, %36, %cst_13 [2] : vector<2x8x8xf32> to vector<2x8xf32>
    %38 = vector.shape_cast %37 : vector<2x8xf32> to vector<2x8x1xf32>
    %39 = tpu.reciprocal %38 {approx = true} : vector<2x8x1xf32> -> vector<2x8x1xf32>
    %40 = vector.broadcast %39 : vector<2x8x1xf32> to vector<2x8x8xf32>
    %41 = arith.mulf %36, %40 : vector<2x8x8xf32>
    %42 = arith.truncf %41 : vector<2x8x8xf32> to vector<2x8x8xbf16>
    "tpu.trace_start"() <{level = 10 : i32, message = "bqk,bkd->bqd"}> : () -> ()
    %cst_14 = arith.constant dense<0.000000e+00> : vector<2x8x8xf32>
    %43 = tpu.matmul %42, %25, %cst_14 {dimension_numbers = #tpu.dot_dimension_numbers<[2], [1], [1], [2], [0, 0, 0, 1, 1, 2], [0], [0]>} : vector<2x8x8xbf16>, vector<2x8x8xbf16>, vector<2x8x8xf32> -> vector<2x8x8xf32>
    "tpu.trace_stop"() : () -> ()
    %44 = vector.shape_cast %43 : vector<2x8x8xf32> to vector<16x8xf32>
    %45 = arith.truncf %44 : vector<16x8xf32> to vector<16x8xbf16>
    %c0_15 = arith.constant 0 : index
    %c0_16 = arith.constant 0 : index
    %c0_17 = arith.constant 0 : index
    %46 = vector.load %arg5[%c0_15, %c0_16, %c0_17] : memref<4x8x32xbf16, #tpu.memory_space<vmem>>, vector<1x8x32xbf16>
    %47 = vector.shape_cast %46 : vector<1x8x32xbf16> to vector<8x32xbf16>
    %cst_18 = arith.constant dense<0.000000e+00> : vector<16x32xf32>
    %48 = tpu.matmul %45, %47, %cst_18 {dimension_numbers = #tpu.dot_dimension_numbers<[1], [0], [0], [1], [0, 0, 1, 1], [], []>} : vector<16x8xbf16>, vector<8x32xbf16>, vector<16x32xf32> -> vector<16x32xf32>
    %49 = arith.addf %16, %48 : vector<16x32xf32>
    %50 = vector.extract_strided_slice %5 {offsets = [0, 8], sizes = [16, 8], strides = [1, 1]} : vector<16x96xf32> to vector<16x8xf32>
    %51 = vector.extract_strided_slice %5 {offsets = [0, 40], sizes = [16, 8], strides = [1, 1]} : vector<16x96xf32> to vector<16x8xf32>
    %52 = vector.extract_strided_slice %5 {offsets = [0, 72], sizes = [16, 8], strides = [1, 1]} : vector<16x96xf32> to vector<16x8xf32>
    %53 = vector.shape_cast %50 : vector<16x8xf32> to vector<2x8x8xf32>
    %54 = arith.truncf %53 : vector<2x8x8xf32> to vector<2x8x8xbf16>
    %55 = vector.shape_cast %51 : vector<16x8xf32> to vector<2x8x8xf32>
    %56 = arith.truncf %55 : vector<2x8x8xf32> to vector<2x8x8xbf16>
    %57 = vector.shape_cast %52 : vector<16x8xf32> to vector<2x8x8xf32>
    %58 = arith.truncf %57 : vector<2x8x8xf32> to vector<2x8x8xbf16>
    "tpu.trace_start"() <{level = 10 : i32, message = "bqd,bkd->bqk"}> : () -> ()
    %cst_19 = arith.constant dense<0.000000e+00> : vector<2x8x8xf32>
    %59 = tpu.matmul %54, %56, %cst_19 {dimension_numbers = #tpu.dot_dimension_numbers<[2], [2], [1], [1], [0, 0, 0, 1, 1, 1], [0], [0]>} : vector<2x8x8xbf16>, vector<2x8x8xbf16>, vector<2x8x8xf32> -> vector<2x8x8xf32>
    "tpu.trace_stop"() : () -> ()
    %60 = vector.extract_strided_slice %15 {offsets = [1, 0, 0], sizes = [1, 8, 8], strides = [1, 1, 1]} : vector<4x8x8xf32> to vector<1x8x8xf32>
    %61 = vector.shape_cast %60 : vector<1x8x8xf32> to vector<8x8xf32>
    %62 = vector.shape_cast %61 : vector<8x8xf32> to vector<1x8x8xf32>
    %63 = vector.broadcast %62 : vector<1x8x8xf32> to vector<2x8x8xf32>
    %64 = arith.addf %59, %63 : vector<2x8x8xf32>
    %cst_20 = arith.constant dense<0xFF800000> : vector<2x8xf32>
    %65 = vector.multi_reduction <maximumf>, %64, %cst_20 [2] : vector<2x8x8xf32> to vector<2x8xf32>
    %66 = vector.shape_cast %65 : vector<2x8xf32> to vector<2x8x1xf32>
    %67 = vector.broadcast %66 : vector<2x8x1xf32> to vector<2x8x8xf32>
    %68 = arith.subf %64, %67 : vector<2x8x8xf32>
    %69 = math.exp %68 : vector<2x8x8xf32>
    %cst_21 = arith.constant dense<0.000000e+00> : vector<2x8xf32>
    %70 = vector.multi_reduction <add>, %69, %cst_21 [2] : vector<2x8x8xf32> to vector<2x8xf32>
    %71 = vector.shape_cast %70 : vector<2x8xf32> to vector<2x8x1xf32>
    %72 = tpu.reciprocal %71 {approx = true} : vector<2x8x1xf32> -> vector<2x8x1xf32>
    %73 = vector.broadcast %72 : vector<2x8x1xf32> to vector<2x8x8xf32>
    %74 = arith.mulf %69, %73 : vector<2x8x8xf32>
    %75 = arith.truncf %74 : vector<2x8x8xf32> to vector<2x8x8xbf16>
    "tpu.trace_start"() <{level = 10 : i32, message = "bqk,bkd->bqd"}> : () -> ()
    %cst_22 = arith.constant dense<0.000000e+00> : vector<2x8x8xf32>
    %76 = tpu.matmul %75, %58, %cst_22 {dimension_numbers = #tpu.dot_dimension_numbers<[2], [1], [1], [2], [0, 0, 0, 1, 1, 2], [0], [0]>} : vector<2x8x8xbf16>, vector<2x8x8xbf16>, vector<2x8x8xf32> -> vector<2x8x8xf32>
    "tpu.trace_stop"() : () -> ()
    %77 = vector.shape_cast %76 : vector<2x8x8xf32> to vector<16x8xf32>
    %78 = arith.truncf %77 : vector<16x8xf32> to vector<16x8xbf16>
    %c1 = arith.constant 1 : index
    %c0_23 = arith.constant 0 : index
    %c0_24 = arith.constant 0 : index
    %79 = vector.load %arg5[%c1, %c0_23, %c0_24] : memref<4x8x32xbf16, #tpu.memory_space<vmem>>, vector<1x8x32xbf16>
    %80 = vector.shape_cast %79 : vector<1x8x32xbf16> to vector<8x32xbf16>
    %cst_25 = arith.constant dense<0.000000e+00> : vector<16x32xf32>
    %81 = tpu.matmul %78, %80, %cst_25 {dimension_numbers = #tpu.dot_dimension_numbers<[1], [0], [0], [1], [0, 0, 1, 1], [], []>} : vector<16x8xbf16>, vector<8x32xbf16>, vector<16x32xf32> -> vector<16x32xf32>
    %82 = arith.addf %49, %81 : vector<16x32xf32>
    %83 = vector.extract_strided_slice %5 {offsets = [0, 16], sizes = [16, 8], strides = [1, 1]} : vector<16x96xf32> to vector<16x8xf32>
    %84 = vector.extract_strided_slice %5 {offsets = [0, 48], sizes = [16, 8], strides = [1, 1]} : vector<16x96xf32> to vector<16x8xf32>
    %85 = vector.extract_strided_slice %5 {offsets = [0, 80], sizes = [16, 8], strides = [1, 1]} : vector<16x96xf32> to vector<16x8xf32>
    %86 = vector.shape_cast %83 : vector<16x8xf32> to vector<2x8x8xf32>
    %87 = arith.truncf %86 : vector<2x8x8xf32> to vector<2x8x8xbf16>
    %88 = vector.shape_cast %84 : vector<16x8xf32> to vector<2x8x8xf32>
    %89 = arith.truncf %88 : vector<2x8x8xf32> to vector<2x8x8xbf16>
    %90 = vector.shape_cast %85 : vector<16x8xf32> to vector<2x8x8xf32>
    %91 = arith.truncf %90 : vector<2x8x8xf32> to vector<2x8x8xbf16>
    "tpu.trace_start"() <{level = 10 : i32, message = "bqd,bkd->bqk"}> : () -> ()
    %cst_26 = arith.constant dense<0.000000e+00> : vector<2x8x8xf32>
    %92 = tpu.matmul %87, %89, %cst_26 {dimension_numbers = #tpu.dot_dimension_numbers<[2], [2], [1], [1], [0, 0, 0, 1, 1, 1], [0], [0]>} : vector<2x8x8xbf16>, vector<2x8x8xbf16>, vector<2x8x8xf32> -> vector<2x8x8xf32>
    "tpu.trace_stop"() : () -> ()
    %93 = vector.extract_strided_slice %15 {offsets = [2, 0, 0], sizes = [1, 8, 8], strides = [1, 1, 1]} : vector<4x8x8xf32> to vector<1x8x8xf32>
    %94 = vector.shape_cast %93 : vector<1x8x8xf32> to vector<8x8xf32>
    %95 = vector.shape_cast %94 : vector<8x8xf32> to vector<1x8x8xf32>
    %96 = vector.broadcast %95 : vector<1x8x8xf32> to vector<2x8x8xf32>
    %97 = arith.addf %92, %96 : vector<2x8x8xf32>
    %cst_27 = arith.constant dense<0xFF800000> : vector<2x8xf32>
    %98 = vector.multi_reduction <maximumf>, %97, %cst_27 [2] : vector<2x8x8xf32> to vector<2x8xf32>
    %99 = vector.shape_cast %98 : vector<2x8xf32> to vector<2x8x1xf32>
    %100 = vector.broadcast %99 : vector<2x8x1xf32> to vector<2x8x8xf32>
    %101 = arith.subf %97, %100 : vector<2x8x8xf32>
    %102 = math.exp %101 : vector<2x8x8xf32>
    %cst_28 = arith.constant dense<0.000000e+00> : vector<2x8xf32>
    %103 = vector.multi_reduction <add>, %102, %cst_28 [2] : vector<2x8x8xf32> to vector<2x8xf32>
    %104 = vector.shape_cast %103 : vector<2x8xf32> to vector<2x8x1xf32>
    %105 = tpu.reciprocal %104 {approx = true} : vector<2x8x1xf32> -> vector<2x8x1xf32>
    %106 = vector.broadcast %105 : vector<2x8x1xf32> to vector<2x8x8xf32>
    %107 = arith.mulf %102, %106 : vector<2x8x8xf32>
    %108 = arith.truncf %107 : vector<2x8x8xf32> to vector<2x8x8xbf16>
    "tpu.trace_start"() <{level = 10 : i32, message = "bqk,bkd->bqd"}> : () -> ()
    %cst_29 = arith.constant dense<0.000000e+00> : vector<2x8x8xf32>
    %109 = tpu.matmul %108, %91, %cst_29 {dimension_numbers = #tpu.dot_dimension_numbers<[2], [1], [1], [2], [0, 0, 0, 1, 1, 2], [0], [0]>} : vector<2x8x8xbf16>, vector<2x8x8xbf16>, vector<2x8x8xf32> -> vector<2x8x8xf32>
    "tpu.trace_stop"() : () -> ()
    %110 = vector.shape_cast %109 : vector<2x8x8xf32> to vector<16x8xf32>
    %111 = arith.truncf %110 : vector<16x8xf32> to vector<16x8xbf16>
    %c2 = arith.constant 2 : index
    %c0_30 = arith.constant 0 : index
    %c0_31 = arith.constant 0 : index
    %112 = vector.load %arg5[%c2, %c0_30, %c0_31] : memref<4x8x32xbf16, #tpu.memory_space<vmem>>, vector<1x8x32xbf16>
    %113 = vector.shape_cast %112 : vector<1x8x32xbf16> to vector<8x32xbf16>
    %cst_32 = arith.constant dense<0.000000e+00> : vector<16x32xf32>
    %114 = tpu.matmul %111, %113, %cst_32 {dimension_numbers = #tpu.dot_dimension_numbers<[1], [0], [0], [1], [0, 0, 1, 1], [], []>} : vector<16x8xbf16>, vector<8x32xbf16>, vector<16x32xf32> -> vector<16x32xf32>
    %115 = arith.addf %82, %114 : vector<16x32xf32>
    %116 = vector.extract_strided_slice %5 {offsets = [0, 24], sizes = [16, 8], strides = [1, 1]} : vector<16x96xf32> to vector<16x8xf32>
    %117 = vector.extract_strided_slice %5 {offsets = [0, 56], sizes = [16, 8], strides = [1, 1]} : vector<16x96xf32> to vector<16x8xf32>
    %118 = vector.extract_strided_slice %5 {offsets = [0, 88], sizes = [16, 8], strides = [1, 1]} : vector<16x96xf32> to vector<16x8xf32>
    %119 = vector.shape_cast %116 : vector<16x8xf32> to vector<2x8x8xf32>
    %120 = arith.truncf %119 : vector<2x8x8xf32> to vector<2x8x8xbf16>
    %121 = vector.shape_cast %117 : vector<16x8xf32> to vector<2x8x8xf32>
    %122 = arith.truncf %121 : vector<2x8x8xf32> to vector<2x8x8xbf16>
    %123 = vector.shape_cast %118 : vector<16x8xf32> to vector<2x8x8xf32>
    %124 = arith.truncf %123 : vector<2x8x8xf32> to vector<2x8x8xbf16>
    "tpu.trace_start"() <{level = 10 : i32, message = "bqd,bkd->bqk"}> : () -> ()
    %cst_33 = arith.constant dense<0.000000e+00> : vector<2x8x8xf32>
    %125 = tpu.matmul %120, %122, %cst_33 {dimension_numbers = #tpu.dot_dimension_numbers<[2], [2], [1], [1], [0, 0, 0, 1, 1, 1], [0], [0]>} : vector<2x8x8xbf16>, vector<2x8x8xbf16>, vector<2x8x8xf32> -> vector<2x8x8xf32>
    "tpu.trace_stop"() : () -> ()
    %126 = vector.extract_strided_slice %15 {offsets = [3, 0, 0], sizes = [1, 8, 8], strides = [1, 1, 1]} : vector<4x8x8xf32> to vector<1x8x8xf32>
    %127 = vector.shape_cast %126 : vector<1x8x8xf32> to vector<8x8xf32>
    %128 = vector.shape_cast %127 : vector<8x8xf32> to vector<1x8x8xf32>
    %129 = vector.broadcast %128 : vector<1x8x8xf32> to vector<2x8x8xf32>
    %130 = arith.addf %125, %129 : vector<2x8x8xf32>
    %cst_34 = arith.constant dense<0xFF800000> : vector<2x8xf32>
    %131 = vector.multi_reduction <maximumf>, %130, %cst_34 [2] : vector<2x8x8xf32> to vector<2x8xf32>
    %132 = vector.shape_cast %131 : vector<2x8xf32> to vector<2x8x1xf32>
    %133 = vector.broadcast %132 : vector<2x8x1xf32> to vector<2x8x8xf32>
    %134 = arith.subf %130, %133 : vector<2x8x8xf32>
    %135 = math.exp %134 : vector<2x8x8xf32>
    %cst_35 = arith.constant dense<0.000000e+00> : vector<2x8xf32>
    %136 = vector.multi_reduction <add>, %135, %cst_35 [2] : vector<2x8x8xf32> to vector<2x8xf32>
    %137 = vector.shape_cast %136 : vector<2x8xf32> to vector<2x8x1xf32>
    %138 = tpu.reciprocal %137 {approx = true} : vector<2x8x1xf32> -> vector<2x8x1xf32>
    %139 = vector.broadcast %138 : vector<2x8x1xf32> to vector<2x8x8xf32>
    %140 = arith.mulf %135, %139 : vector<2x8x8xf32>
    %141 = arith.truncf %140 : vector<2x8x8xf32> to vector<2x8x8xbf16>
    "tpu.trace_start"() <{level = 10 : i32, message = "bqk,bkd->bqd"}> : () -> ()
    %cst_36 = arith.constant dense<0.000000e+00> : vector<2x8x8xf32>
    %142 = tpu.matmul %141, %124, %cst_36 {dimension_numbers = #tpu.dot_dimension_numbers<[2], [1], [1], [2], [0, 0, 0, 1, 1, 2], [0], [0]>} : vector<2x8x8xbf16>, vector<2x8x8xbf16>, vector<2x8x8xf32> -> vector<2x8x8xf32>
    "tpu.trace_stop"() : () -> ()
    %143 = vector.shape_cast %142 : vector<2x8x8xf32> to vector<16x8xf32>
    %144 = arith.truncf %143 : vector<16x8xf32> to vector<16x8xbf16>
    %c3 = arith.constant 3 : index
    %c0_37 = arith.constant 0 : index
    %c0_38 = arith.constant 0 : index
    %145 = vector.load %arg5[%c3, %c0_37, %c0_38] : memref<4x8x32xbf16, #tpu.memory_space<vmem>>, vector<1x8x32xbf16>
    %146 = vector.shape_cast %145 : vector<1x8x32xbf16> to vector<8x32xbf16>
    %cst_39 = arith.constant dense<0.000000e+00> : vector<16x32xf32>
    %147 = tpu.matmul %144, %146, %cst_39 {dimension_numbers = #tpu.dot_dimension_numbers<[1], [0], [0], [1], [0, 0, 1, 1], [], []>} : vector<16x8xbf16>, vector<8x32xbf16>, vector<16x32xf32> -> vector<16x32xf32>
    %148 = arith.addf %115, %147 : vector<16x32xf32>
    %c0_40 = arith.constant 0 : index
    %c0_41 = arith.constant 0 : index
    %149 = vector.load %arg6[%c0_40, %c0_41] : memref<1x32xf32, #tpu.memory_space<vmem>>, vector<1x32xf32>
    %150 = vector.broadcast %149 : vector<1x32xf32> to vector<16x32xf32>
    %151 = arith.addf %148, %150 : vector<16x32xf32>
    %c0_42 = arith.constant 0 : index
    %c0_43 = arith.constant 0 : index
    %152 = vector.load %arg7[%c0_42, %c0_43] : memref<16x32xf32, #tpu.memory_space<vmem>>, vector<16x32xf32>
    tpu.vector_store %arg7[%c0_42, %c0_43], %151 {strides = array<i32>} : memref<16x32xf32, #tpu.memory_space<vmem>>, vector<16x32xf32>,
    return
  }
  func.func @transform_0(%arg0: i32) -> (i32, i32) {
    %c0_i32 = arith.constant 0 : i32
    %c0_i32_0 = arith.constant 0 : i32
    return %arg0, %c0_i32 : i32, i32
  }
  func.func @transform_1(%arg0: i32) -> (i32, i32) {
    %c0_i32 = arith.constant 0 : i32
    %c0_i32_0 = arith.constant 0 : i32
    %c0_i32_1 = arith.constant 0 : i32
    return %c0_i32, %c0_i32_0 : i32, i32
  }
  func.func @transform_2(%arg0: i32) -> (i32, i32) {
    %c0_i32 = arith.constant 0 : i32
    %c0_i32_0 = arith.constant 0 : i32
    %c0_i32_1 = arith.constant 0 : i32
    return %c0_i32, %c0_i32_0 : i32, i32
  }
  func.func @transform_3(%arg0: i32) -> (i32, i32, i32) {
    %c0_i32 = arith.constant 0 : i32
    %c0_i32_0 = arith.constant 0 : i32
    %c0_i32_1 = arith.constant 0 : i32
    %c0_i32_2 = arith.constant 0 : i32
    return %c0_i32, %c0_i32_0, %c0_i32_1 : i32, i32, i32
  }
  func.func @transform_4(%arg0: i32) -> (i32, i32, i32) {
    %c0_i32 = arith.constant 0 : i32
    %c0_i32_0 = arith.constant 0 : i32
    %c0_i32_1 = arith.constant 0 : i32
    %c0_i32_2 = arith.constant 0 : i32
    return %c0_i32, %c0_i32_0, %c0_i32_1 : i32, i32, i32
  }
  func.func @transform_5(%arg0: i32) -> (i32, i32) {
    %c0_i32 = arith.constant 0 : i32
    %c0_i32_0 = arith.constant 0 : i32
    %c0_i32_1 = arith.constant 0 : i32
    return %c0_i32, %c0_i32_0 : i32, i32
  }
  func.func @transform_6(%arg0: i32) -> (i32, i32) {
    %c0_i32 = arith.constant 0 : i32
    %c0_i32_0 = arith.constant 0 : i32
    return %arg0, %c0_i32 : i32, i32
  }
}

</mosaic_0001>

<bundles_post_ra>
// kernel: tpu_custom_call.1
= control target key start
LH: loop header
LB: loop body
LE: loop exit
PB: predicated region body
PF: predicated region fallthrough
CT: control target
= control target key end

     0   :  { %11 = vsyncpa [#allocation3], 0  ;;  %s1923_s0 = inlined_call_operand.hbm [shape: bf16[16,32], index: 0, kind: input, shape index: {}]   ;;  %s1924_s1 = inlined_call_operand.hbm [shape: bf16[32,96], index: 1, kind: input, shape index: {}]   ;;  %s1925_s2 = inlined_call_operand.vmem [shape: f32[1,96], index: 2, kind: input, shape index: {}]   ;;  %s1926_s3 = inlined_call_operand.hbm [shape: f32[4,8,8], index: 3, kind: input, shape index: {}]   ;;  %s1927_s4 = inlined_call_operand.hbm [shape: bf16[4,8,32], index: 4, kind: input, shape index: {}]   ;;  %s1928_s5 = inlined_call_operand.vmem [shape: f32[1,32], index: 5, kind: input, shape index: {}]   ;;  %s1929_s6 = inlined_call_operand.hbm [shape: f32[16,32], index: 6, kind: output, shape index: {}]  }
   0x1   :  { %12 = vsyncpa [#allocation6], 0 }
   0x2   :  { %13 = vsyncpa [#allocation9], 0 }
   0x3   :  { %14 = vsyncpa [#allocation4], 0  ;;  %s1646_s21 = smov [#allocation5]   ;;  %s1647_s23 = smov [#allocation2]  }
   0x4   :  { %s32_s22 = sshll.u32 %s1646_s21, 4  ;;  %s20_s24 = sshll.u32 %s1647_s23, 4  ;;  %s33_s22 = int_to_ptr.vmem [resolvable:$true] %s32_s22  ;;  %s21_s24 = int_to_ptr.vmem [resolvable:$true] %s20_s24 }
   0x5   :  { %s1546_s25 = scalar_lea.vmem %s33_s22, 256  ;;  %p1551_p1 = scmp.lt.s32.totalorder %s33_s22, %s33_s22 }
   0x6   :  { %p1547_p0 = scmp.ne.s32.totalorder %s33_s22, %s1546_s25  ;;  %p1552_p2 = scmp.lt.s32.totalorder %s1546_s25, %s1546_s25 }
   0x8   :  { %p1553_p3 = por %p1552_p2, %p1551_p1 }
   0xa   :  { %p1554_p4 = pnand %p1553_p3, %p1547_p0 }
   0xc   :  { %1557 = shalt.err (!%p1554_p4)
}
   0xd   :  { %s1648_s26 = smov 64   ;;  %s1649_s27 = smov 4  }
   0xe   :  { %38 = dma.hbm_to_vmem [thread:$0]  %s1924_s1, 256, %s33_s22, [#allocation6], %s1648_s26, %s1648_s26, %s1649_s27  }
   0xf   :  { %s1566_s30 = scalar_lea.vmem %s21_s24, 128  ;;  %p1571_p6 = scmp.lt.s32.totalorder %s21_s24, %s21_s24 }
  0x10   :  { %p1567_p5 = scmp.ne.s32.totalorder %s21_s24, %s1566_s30  ;;  %p1572_p7 = scmp.lt.s32.totalorder %s1566_s30, %s1566_s30 }
  0x12   :  { %p1573_p8 = por %p1572_p7, %p1571_p6 }
  0x14   :  { %p1574_p9 = pnand %p1573_p8, %p1567_p5 }
  0x16   :  { %1577 = shalt.err (!%p1574_p9)
}
  0x17   :  { %26 = dma.hbm_to_vmem [thread:$0]  %s1923_s0, 128, %s21_s24, [#allocation3], %s1648_s26, %s1648_s26, %s1649_s27  }
  0x18   :  { %s1650_s9 = smov [#allocation7]  }
  0x19   :  { %s46_s10 = sshll.u32 %s1650_s9, 4  ;;  %s47_s10 = int_to_ptr.vmem [resolvable:$true] %s46_s10 }
  0x1a   :  { %s1586_s11 = scalar_lea.vmem %s47_s10, 512  ;;  %p1591_p11 = scmp.lt.s32.totalorder %s47_s10, %s47_s10 }
  0x1b   :  { %p1587_p10 = scmp.ne.s32.totalorder %s47_s10, %s1586_s11  ;;  %p1592_p12 = scmp.lt.s32.totalorder %s1586_s11, %s1586_s11 }
  0x1d   :  { %p1593_p13 = por %p1592_p12, %p1591_p11 }
  0x1f   :  { %p1594_p0 = pnand %p1593_p13, %p1587_p10 }
  0x21   :  { %1597 = shalt.err (!%p1594_p0)
}
  0x22   :  { %s1651_s1 = smov 128   ;;  %s1652_s12 = smov 8  }
  0x23   :  { %52 = dma.hbm_to_vmem [thread:$0]  %s1926_s3, 512, %s47_s10, [#allocation6], %s1651_s1, %s1651_s1, %s1652_s12  }
  0x24   :  { %s1653_s0 = smov [#allocation8]  }
  0x25   :  { %s58_s15 = sshll.u32 %s1653_s0, 4  ;;  %s59_s15 = int_to_ptr.vmem [resolvable:$true] %s58_s15 }
  0x26   :  { %s1606_s16 = scalar_lea.vmem %s59_s15, 256  ;;  %p1611_p2 = scmp.lt.s32.totalorder %s59_s15, %s59_s15 }
  0x27   :  { %p1607_p1 = scmp.ne.s32.totalorder %s59_s15, %s1606_s16  ;;  %p1612_p3 = scmp.lt.s32.totalorder %s1606_s16, %s1606_s16 }
  0x29   :  { %p1613_p4 = por %p1612_p3, %p1611_p2 }
  0x2b   :  { %p1614_p5 = pnand %p1613_p4, %p1607_p1 }
  0x2d   :  { %1617 = shalt.err (!%p1614_p5)
}
  0x2e   :  { %64 = dma.hbm_to_vmem [thread:$0]  %s1927_s4, 256, %s59_s15, [#allocation9], %s1648_s26, %s1648_s26, %s1649_s27  }
  0x2f   :  { %1638 = dma.done.wait [#allocation3], 128  }
  0x30   :  { %1639 = vsyncadd [#allocation3], 4294967168 }
  0x31   :  { %1640 = dma.done.wait [#allocation6], 768  }
  0x32   :  { %1641 = vsyncadd [#allocation6], 4294966528 }
  0x33   :  { %1642 = dma.done.wait [#allocation9], 256  }
  0x34   :  { %1643 = vsyncadd [#allocation9], 4294967040  ;;  %v1654_v0 = vmov 0.0   ;;  %vm1655_vm0 = vmmov 0   ;;  %v1503_v1 = vld [vmem:[#allocation5 + $0x8] sm:$0xff]   ;;  %v1504_v2 = vld [vmem:[#allocation5] sm:$0xff]   ;;  %v159_v17 = vlaneseq }
  0x35   :  { %1353 = vmatprep.subr.bf16.mxu0 %v1654_v0  ;;  %1357 = vmatprep.mubr.msk.bf16.mxu0 %vm1655_vm0, %v1654_v0  ;;  %v1505_v3 = vld [vmem:[#allocation2] sm:$0xff]   ;;  %vm110_vm1 = vcmask 261120   ;;  %s1656_s19 = smov 96   ;;  %vm174_vm2 = vcmask 64512   ;;  %v155_v20 = vld [vmem:[#allocation7] sm:$0xff]  ;;  %vm299_vm4 = vcmask 1043456  }
  0x36   :  { %1361 = vmatprep.subr.bf16.mxu1 %v1654_v0  ;;  %1363 = vmatprep.mubr.msk.bf16.mxu1 %vm1655_vm0, %v1654_v0  ;;  %v1284_v4 = vld [vmem:[%s1925_s2] ss:$0 sm:$0xff]  ;;  %v160_v18 = vshrl.u32 %v159_v17, 7  ;;  %v162_v19 = vand.u32 127, %v159_v17  ;;  %v1657_v21 = vmov -1e+30  }
  0x37   :  { %1354 = vmatpush3.bf16.msra.mxu0 %v1503_v1  ;;  %s1658_s2 = smov 88   ;;  %s1659_s20 = smov 120  }
  0x38   :  { %1355 = vmatprep.subr.bf16.mxu0 %v1654_v0  ;;  %vm163_vm3 = vcmp.ge.s32.totalorder %v160_v18, %v162_v19  ;;  %s1660_s21 = smov 56   ;;  %s1661_s22 = smov 112  }
  0x39   :  { %v1759_v22 = vsel %vm163_vm3, 0.0, %v1657_v21  ;;  %s1662_s23 = smov 80   ;;  %s1663_s24 = smov 48  }
  0x3a   :  { %v165_v23 = vadd.f32 %v1759_v22, %v155_v20  ;;  %s1664_s25 = smov 72   ;;  %s1666_s27 = smov 40  }
  0x3b   :  { %1356 = vmatpush3.bf16.msra.mxu0 %v1504_v2  ;;  %s1667_s30 = smov [#allocation10]  }
  0x3c   :  { %1367 = vmatprep.subr.bf16.mxu0 %v1654_v0  ;;  %s1270_s7 = sshll.u32 %s1667_s30, 4  ;;  %s1271_s7 = int_to_ptr.vmem [resolvable:$true] %s1270_s7 }
  0x3d   :  { %s1618_s8 = scalar_lea.vmem %s1271_s7, 256  ;;  %p1623_p7 = scmp.lt.s32.totalorder %s1271_s7, %s1271_s7 }
  0x3e   :  { %1358 = vmatmul.mubr.msk.bf16.vlgmr.msra.gmra.mxu0 %vm110_vm1, %v1505_v3  ;;  %v156_v3 = vld [vmem:[#allocation7 + $0x8] sm:$0xff]  ;;  %p1619_p6 = scmp.ne.s32.totalorder %s1271_s7, %s1618_s8  ;;  %p1624_p8 = scmp.lt.s32.totalorder %s1618_s8, %s1618_s8 }
  0x3f   :  { %1369 = vmatprep.mubr.msk.bf16.mxu0 %vm1655_vm0, %v1654_v0 }
  0x40   :  { %p1625_p9 = por %p1624_p8, %p1623_p7 }
  0x42   :  { %p1626_p10 = pnand %p1625_p9, %p1619_p6 }
  0xfe   :  { %v148_v5 = vpop.f32.mrf.mxu0 }
  0xff   :  { %v149_v6 = vadd.f32 %v1284_v4, %v148_v5 }
 0x100   :  { %v1359_v7 = vpop.f32.mrf.mxu0 }
 0x101   :  { %v1741_v8 = vpack.c.bf16 %v149_v6, %v149_v6  ;;  %v166_v7 = vadd.f32 %v1759_v22, %v156_v3 }
 0x102   :  { %v151_v9 = vpop.f32.mrf.mxu0 }
 0x103   :  { %v152_v10 = vadd.f32 %v1284_v4, %v151_v9  ;;  %172 = vrot.lane.b32.xlu0 %v1741_v8, %s1656_s19 }
 0x104   :  { %v1360_v11 = vpop.f32.mrf.mxu0 }
 0x105   :  { %v1744_v12 = vpack.c.bf16 %v152_v10, %v152_v10 }
 0x107   :  { %222 = vrot.lane.b32.xlu0 %v1744_v12, %s1656_s19 }
 0x175   :  { %v173_v13 = vpop.permute.xlu0 %172 }
 0x176   :  { %v179_v14 = vsel %vm174_vm2, %v173_v13, 0 }
 0x177   :  { %1362 = vmatpush3.bf16.xpose.msra.mxu1 %v179_v14 }
 0x178   :  { %1373 = vmatprep.subr.bf16.mxu1 %v1654_v0 }
 0x179   :  { %v223_v15 = vpop.permute.xlu0 %222 }
 0x17a   :  { %v228_v16 = vsel %vm174_vm2, %v223_v15, 0 }
 0x17b   :  { %1368 = vmatpush3.bf16.xpose.msra.mxu0 %v228_v16 }
 0x17c   :  { %1379 = vmatprep.subr.bf16.mxu0 %v1654_v0 }
 0x17e   :  { %1364 = vmatmul.mubr.msk.bf16.vlgmr.msra.gmra.mxu1 %vm174_vm2, %v1741_v8 }
 0x17f   :  { %1375 = vmatprep.mubr.msk.bf16.mxu1 %vm1655_vm0, %v1654_v0 }
 0x182   :  { %1370 = vmatmul.mubr.msk.bf16.vlgmr.msra.gmra.mxu0 %vm174_vm2, %v1744_v12 }
 0x183   :  { %1381 = vmatprep.mubr.msk.bf16.mxu0 %vm1655_vm0, %v1654_v0 }
 0x23e   :  { %v215_v24 = vpop.f32.mrf.mxu1 }
 0x23f   :  { %v216_v25 = vadd.f32 %v215_v24, %v165_v23 }
 0x240   :  { %v1365_v26 = vpop.f32.mrf.mxu1 }
 0x241   :  { %v270_v27 = vsel %vm174_vm2, %v216_v25, -inf }
 0x242   :  { %271 = vmax.xlane.f32.xlu1 %v270_v27  ;;  %v218_v28 = vpop.f32.mrf.mxu1  ;;  %v264_v29 = vpop.f32.mrf.mxu0 }
 0x243   :  { %v265_v30 = vadd.f32 %v264_v29, %v165_v23 }
 0x244   :  { %v1366_v31 = vpop.f32.mrf.mxu1  ;;  %v1371_v32 = vpop.f32.mrf.mxu0 }
 0x245   :  { %v273_v33 = vsel %vm174_vm2, %v265_v30, -inf }
 0x246   :  { %274 = vmax.xlane.f32.xlu1 %v273_v33  ;;  %v267_v34 = vpop.f32.mrf.mxu0 }
 0x248   :  { %v1372_v35 = vpop.f32.mrf.mxu0 }
 0x257   :  { %294 = vrot.lane.b32.xlu1 %v1741_v8, %s1648_s26 }
 0x25b   :  { %343 = vrot.lane.b32.xlu1 %v1744_v12, %s1648_s26  ;;  %s1665_s26 = smov 104  }
 0x25f   :  { %395 = vrot.lane.b32.xlu1 %v1741_v8, %s1658_s2 }
 0x2cb   :  { %v272_v36 = vpop.xlane.xlu1 %271 }
 0x2cc   :  { %v276_v37 = vsub.f32 %v216_v25, %v272_v36 }
 0x2ce   :  { %v278_v38 = vmul.f32 1.442695, %v276_v37 }
 0x2cf   :  { %v275_v39 = vpop.xlane.xlu1 %274 }
 0x2d0   :  { %1506 = vpow2.f32 %v278_v38  ;;  %v277_v40 = vsub.f32 %v265_v30, %v275_v39 }
 0x2d2   :  { %v280_v41 = vmul.f32 1.442695, %v277_v40 }
 0x2d3   :  { %v295_v42 = vpop.permute.xlu1 %294 }
 0x2d4   :  { %1508 = vpow2.f32 %v280_v41  ;;  %v301_v43 = vsel %vm299_vm4, %v295_v42, 0 }
 0x2d5   :  { %1374 = vmatpush3.bf16.msra.mxu1 %v301_v43 }
 0x2d6   :  { %1385 = vmatprep.subr.bf16.mxu1 %v1654_v0 }
 0x2d7   :  { %v344_v44 = vpop.permute.xlu1 %343 }
 0x2d8   :  { %v349_v45 = vsel %vm299_vm4, %v344_v44, 0 }
 0x2d9   :  { %1380 = vmatpush3.bf16.msra.mxu0 %v349_v45 }
 0x2da   :  { %1391 = vmatprep.subr.bf16.mxu0 %v1654_v0 }
 0x2db   :  { %v396_v50 = vpop.permute.xlu1 %395 }
 0x2dc   :  { %v401_v57 = vsel %vm174_vm2, %v396_v50, 0 }
 0x2dd   :  { %v1507_v46 = vpop.eup %1506 }
 0x2de   :  { %v282_v47 = vsel %vm174_vm2, %v1507_v46, 0.0 }
 0x2df   :  { %283 = vadd.xlane.f32.xlu0 %v282_v47  ;;  %v392_v47 = vld [vmem:[#allocation8] sm:$0xf] }
 0x2e0   :  { %v667_v50 = vsel %vm299_vm4, %v392_v47, 0 }
 0x2e1   :  { %v1509_v48 = vpop.eup %1508 }
 0x2e2   :  { %v285_v49 = vsel %vm174_vm2, %v1509_v48, 0.0 }
 0x2e3   :  { %286 = vadd.xlane.f32.xlu1 %v285_v49 }
 0x2f4   :  { %445 = vrot.lane.b32.xlu1 %v1744_v12, %s1658_s2 }
 0x2f5   :  { %393 = vrot.lane.b32.xlu0 %v1741_v8, %s1659_s20 }
 0x2f8   :  { %443 = vrot.lane.b32.xlu1 %v1744_v12, %s1659_s20 }
 0x368   :  { %v284_v51 = vpop.xlane.xlu0 %283 }
 0x369   :  { %1510 = vrcp.f32 %v284_v51 }
 0x36c   :  { %v287_v52 = vpop.xlane.xlu1 %286  ;;  %v394_v62 = vpop.permute.xlu0 %393 }
 0x36d   :  { %1512 = vrcp.f32 %v287_v52 }
 0x370   :  { %v446_v59 = vpop.permute.xlu1 %445 }
 0x371   :  { %v451_v61 = vsel %vm174_vm2, %v446_v59, 0 }
 0x374   :  { %v444_v63 = vpop.permute.xlu1 %443 }
 0x376   :  { %v1511_v53 = vpop.eup %1510 }
 0x377   :  { %v290_v54 = vmul.f32 %v1511_v53, %v1507_v46 }
 0x379   :  { %v292_v55 = vpack.c.bf16 %v290_v54, %v290_v54 }
 0x37a   :  { %v1513_v56 = vpop.eup %1512 }
 0x37b   :  { %1376 = vmatmul.mubr.msk.bf16.vlgmr.msra.gmra.mxu1 %vm174_vm2, %v292_v55  ;;  %v291_v58 = vmul.f32 %v1513_v56, %v1509_v48  ;;  %v615_v55 = vld [vmem:[#allocation8 + $0x4] sm:$0xf] }
 0x37c   :  { %1386 = vmatpush3.bf16.xpose.msra.mxu1 %v401_v57  ;;  %1387 = vmatprep.mubr.msk.bf16.mxu1 %vm1655_vm0, %v1654_v0  ;;  %v620_v56 = vsel %vm299_vm4, %v615_v55, 0  ;;  %v932_v55 = vld [vmem:[#allocation8 + $0x8] sm:$0xf] }
 0x37d   :  { %v293_v60 = vpack.c.bf16 %v291_v58, %v291_v58  ;;  %1397 = vmatprep.subr.bf16.mxu1 %v1654_v0 }
 0x37f   :  { %1382 = vmatmul.mubr.msk.bf16.vlgmr.msra.gmra.mxu0 %vm174_vm2, %v293_v60 }
 0x380   :  { %1392 = vmatpush3.bf16.xpose.msra.mxu0 %v451_v61  ;;  %1393 = vmatprep.mubr.msk.bf16.mxu0 %vm1655_vm0, %v1654_v0 }
 0x381   :  { %1403 = vmatprep.subr.bf16.mxu0 %v1654_v0 }
 0x383   :  { %1388 = vmatmul.mubr.msk.bf16.vlgmr.msra.gmra.mxu1 %vm174_vm2, %v394_v62 }
 0x384   :  { %1399 = vmatprep.mubr.msk.bf16.mxu1 %vm1655_vm0, %v1654_v0 }
 0x387   :  { %1394 = vmatmul.mubr.msk.bf16.vlgmr.msra.gmra.mxu0 %vm174_vm2, %v444_v63 }
 0x388   :  { %1405 = vmatprep.mubr.msk.bf16.mxu0 %vm1655_vm0, %v1654_v0 }
 0x43b   :  { %v1794_v1 = vpop.f32.mrf.mxu1 }
 0x43d   :  { %v1377_v2 = vpop.f32.mrf.mxu1 }
 0x43f   :  { %v340_v4 = vpop.f32.mrf.mxu1  ;;  %v1796_v5 = vpop.f32.mrf.mxu0 }
 0x440   :  { %v391_v6 = vpack.c.bf16 %v1796_v5, %v1794_v1 }
 0x441   :  { %v1378_v9 = vpop.f32.mrf.mxu1  ;;  %v1383_v10 = vpop.f32.mrf.mxu0 }
 0x443   :  { %v388_v11 = vpop.f32.mrf.mxu0  ;;  %v437_v13 = vpop.f32.mrf.mxu1 }
 0x444   :  { %v438_v14 = vadd.f32 %v437_v13, %v166_v7 }
 0x445   :  { %v1384_v15 = vpop.f32.mrf.mxu0  ;;  %v1389_v16 = vpop.f32.mrf.mxu1 }
 0x446   :  { %v493_v17 = vsel %vm174_vm2, %v438_v14, -inf }
 0x447   :  { %494 = vmax.xlane.f32.xlu1 %v493_v17  ;;  %v440_v18 = vpop.f32.mrf.mxu1  ;;  %v487_v19 = vpop.f32.mrf.mxu0 }
 0x448   :  { %v488_v20 = vadd.f32 %v487_v19, %v166_v7  ;;  %v157_v7 = vld [vmem:[#allocation7 + $0x10] sm:$0xff] }
 0x449   :  { %v1390_v21 = vpop.f32.mrf.mxu1  ;;  %v1395_v23 = vpop.f32.mrf.mxu0  ;;  %v167_v10 = vadd.f32 %v1759_v22, %v157_v7 }
 0x44a   :  { %v496_v24 = vsel %vm174_vm2, %v488_v20, -inf }
 0x44b   :  { %497 = vmax.xlane.f32.xlu0 %v496_v24  ;;  %v490_v25 = vpop.f32.mrf.mxu0 }
 0x44d   :  { %v1396_v26 = vpop.f32.mrf.mxu0 }
 0x461   :  { %565 = vrot.lane.b32.xlu0 %v1744_v12, %s1660_s21 }
 0x465   :  { %710 = vrot.lane.b32.xlu0 %v1741_v8, %s1661_s22 }
 0x4d0   :  { %v495_v27 = vpop.xlane.xlu1 %494 }
 0x4d1   :  { %v499_v28 = vsub.f32 %v438_v14, %v495_v27 }
 0x4d3   :  { %v501_v29 = vmul.f32 1.442695, %v499_v28 }
 0x4d4   :  { %v498_v30 = vpop.xlane.xlu0 %497 }
 0x4d5   :  { %1514 = vpow2.f32 %v501_v29  ;;  %v500_v31 = vsub.f32 %v488_v20, %v498_v30 }
 0x4d7   :  { %v503_v32 = vmul.f32 1.442695, %v500_v31 }
 0x4d8   :  { %v566_v33 = vpop.permute.xlu0 %565 }
 0x4d9   :  { %1516 = vpow2.f32 %v503_v32  ;;  %v571_v34 = vsel %vm299_vm4, %v566_v33, 0 }
 0x4da   :  { %1404 = vmatpush3.bf16.msra.mxu0 %v571_v34 }
 0x4db   :  { %1415 = vmatprep.subr.bf16.mxu0 %v1654_v0 }
 0x4dc   :  { %v711_v5 = vpop.permute.xlu0 %710 }
 0x4e2   :  { %v1515_v35 = vpop.eup %1514 }
 0x4e3   :  { %v505_v36 = vsel %vm174_vm2, %v1515_v35, 0.0 }
 0x4e4   :  { %506 = vadd.xlane.f32.xlu1 %v505_v36 }
 0x4e6   :  { %v1517_v37 = vpop.eup %1516 }
 0x4e7   :  { %v508_v38 = vsel %vm174_vm2, %v1517_v37, 0.0 }
 0x4e8   :  { %509 = vadd.xlane.f32.xlu1 %v508_v38 }
 0x4f9   :  { %517 = vrot.lane.b32.xlu1 %v1741_v8, %s1660_s21 }
 0x4fd   :  { %712 = vrot.lane.b32.xlu1 %v1741_v8, %s1662_s23 }
 0x501   :  { %762 = vrot.lane.b32.xlu1 %v1744_v12, %s1662_s23 }
 0x505   :  { %760 = vrot.lane.b32.xlu1 %v1744_v12, %s1661_s22 }
 0x56d   :  { %v507_v39 = vpop.xlane.xlu1 %506 }
 0x56e   :  { %1518 = vrcp.f32 %v507_v39 }
 0x571   :  { %v510_v40 = vpop.xlane.xlu1 %509 }
 0x572   :  { %1520 = vrcp.f32 %v510_v40 }
 0x575   :  { %v518_v41 = vpop.permute.xlu1 %517 }
 0x576   :  { %v523_v42 = vsel %vm299_vm4, %v518_v41, 0 }
 0x577   :  { %1398 = vmatpush3.bf16.msra.mxu1 %v523_v42 }
 0x578   :  { %1409 = vmatprep.subr.bf16.mxu1 %v1654_v0 }
 0x579   :  { %v713_v51 = vpop.permute.xlu1 %712 }
 0x57a   :  { %v718_v1 = vsel %vm174_vm2, %v713_v51, 0 }
 0x57b   :  { %v1519_v43 = vpop.eup %1518 }
 0x57c   :  { %v513_v44 = vmul.f32 %v1519_v43, %v1515_v35 }
 0x57d   :  { %v763_v52 = vpop.permute.xlu1 %762 }
 0x57e   :  { %v515_v45 = vpack.c.bf16 %v513_v44, %v513_v44  ;;  %v768_v53 = vsel %vm174_vm2, %v763_v52, 0 }
 0x57f   :  { %v1521_v46 = vpop.eup %1520 }
 0x580   :  { %1400 = vmatmul.mubr.msk.bf16.vlgmr.msra.gmra.mxu1 %vm174_vm2, %v515_v45  ;;  %v514_v48 = vmul.f32 %v1521_v46, %v1517_v37 }
 0x581   :  { %1411 = vmatprep.mubr.msk.bf16.mxu1 %vm1655_vm0, %v1654_v0  ;;  %v761_v54 = vpop.permute.xlu1 %760  ;;  %1410 = vmatpush3.bf16.msra.mxu1 %v620_v56  ;;  %v937_v56 = vsel %vm299_vm4, %v932_v55, 0 }
 0x582   :  { %v516_v49 = vpack.c.bf16 %v514_v48, %v514_v48  ;;  %1421 = vmatprep.subr.bf16.mxu1 %v1654_v0 }
 0x584   :  { %1406 = vmatmul.mubr.msk.bf16.vlgmr.msra.gmra.mxu0 %vm174_vm2, %v516_v49 }
 0x585   :  { %1416 = vmatpush3.bf16.msra.mxu0 %v667_v50  ;;  %1417 = vmatprep.mubr.msk.bf16.mxu0 %vm1655_vm0, %v1654_v0 }
 0x586   :  { %1427 = vmatprep.subr.bf16.mxu0 %v1654_v0 }
 0x58c   :  { %1418 = vmatmul.mubr.msk.bf16.vlgmr.msra.gmra.mxu0 %vm174_vm2, %v391_v6 }
 0x58d   :  { %1428 = vmatpush3.bf16.xpose.msra.mxu0 %v768_v53  ;;  %1429 = vmatprep.mubr.msk.bf16.mxu0 %vm1655_vm0, %v1654_v0 }
 0x58e   :  { %1439 = vmatprep.subr.bf16.mxu0 %v1654_v0 }
 0x594   :  { %1430 = vmatmul.mubr.msk.bf16.vlgmr.msra.gmra.mxu0 %vm174_vm2, %v761_v54 }
 0x595   :  { %1441 = vmatprep.mubr.msk.bf16.mxu0 %vm1655_vm0, %v1654_v0 }
 0x640   :  { %v559_v57 = vpop.f32.mrf.mxu1 }
 0x642   :  { %v1401_v58 = vpop.f32.mrf.mxu1 }
 0x644   :  { %v562_v59 = vpop.f32.mrf.mxu1  ;;  %v607_v60 = vpop.f32.mrf.mxu0 }
 0x645   :  { %v613_v61 = vpack.c.bf16 %v607_v60, %v559_v57  ;;  %v158_v59 = vld [vmem:[#allocation7 + $0x18] sm:$0xff] }
 0x646   :  { %v1402_v62 = vpop.f32.mrf.mxu1  ;;  %v1407_v63 = vpop.f32.mrf.mxu0 }
 0x647   :  { %1412 = vmatmul.mubr.msk.bf16.vlgmr.msra.gmra.mxu1 %vm174_vm2, %v613_v61  ;;  %v168_v61 = vadd.f32 %v1759_v22, %v158_v59 }
 0x648   :  { %1422 = vmatpush3.bf16.xpose.msra.mxu1 %v718_v1  ;;  %v610_v2 = vpop.f32.mrf.mxu0  ;;  %1423 = vmatprep.mubr.msk.bf16.mxu1 %vm1655_vm0, %v1654_v0 }
 0x649   :  { %1433 = vmatprep.subr.bf16.mxu1 %v1654_v0 }
 0x64a   :  { %v1408_v3 = vpop.f32.mrf.mxu0 }
 0x64c   :  { %v1841_v4 = vpop.f32.mrf.mxu0 }
 0x64e   :  { %v1419_v6 = vpop.f32.mrf.mxu0 }
 0x64f   :  { %1424 = vmatmul.mubr.msk.bf16.vlgmr.msra.gmra.mxu1 %vm174_vm2, %v711_v5 }
 0x650   :  { %v1844_v9 = vpop.f32.mrf.mxu0  ;;  %1435 = vmatprep.mubr.msk.bf16.mxu1 %vm1655_vm0, %v1654_v0 }
 0x652   :  { %v1420_v11 = vpop.f32.mrf.mxu0 }
 0x654   :  { %v804_v13 = vpop.f32.mrf.mxu0 }
 0x655   :  { %v805_v14 = vadd.f32 %v804_v13, %v167_v10 }
 0x656   :  { %v1431_v15 = vpop.f32.mrf.mxu0 }
 0x657   :  { %v813_v16 = vsel %vm174_vm2, %v805_v14, -inf }
 0x658   :  { %814 = vmax.xlane.f32.xlu1 %v813_v16  ;;  %v807_v17 = vpop.f32.mrf.mxu0 }
 0x65a   :  { %v1432_v18 = vpop.f32.mrf.mxu0 }
 0x669   :  { %834 = vrot.lane.b32.xlu1 %v1741_v8, %s1663_s24 }
 0x66d   :  { %984 = vrot.lane.b32.xlu1 %v1741_v8, %s1664_s25 }
 0x671   :  { %1034 = vrot.lane.b32.xlu1 %v1744_v12, %s1664_s25 }
 0x675   :  { %1032 = vrot.lane.b32.xlu1 %v1744_v12, %s1665_s26 }
 0x6e1   :  { %v815_v19 = vpop.xlane.xlu1 %814 }
 0x6e2   :  { %v817_v23 = vsub.f32 %v805_v14, %v815_v19 }
 0x6e4   :  { %v820_v24 = vmul.f32 1.442695, %v817_v23 }
 0x6e5   :  { %v835_v20 = vpop.permute.xlu1 %834 }
 0x6e6   :  { %v840_v21 = vsel %vm299_vm4, %v835_v20, 0  ;;  %1522 = vpow2.f32 %v820_v24 }
 0x6e7   :  { %1434 = vmatpush3.bf16.msra.mxu1 %v840_v21 }
 0x6e8   :  { %1445 = vmatprep.subr.bf16.mxu1 %v1654_v0 }
 0x6e9   :  { %v985_v48 = vpop.permute.xlu1 %984 }
 0x6ea   :  { %v990_v50 = vsel %vm174_vm2, %v985_v48, 0 }
 0x6ed   :  { %v1035_v1 = vpop.permute.xlu1 %1034 }
 0x6ee   :  { %v1040_v13 = vsel %vm174_vm2, %v1035_v1, 0 }
 0x6f1   :  { %v1033_v16 = vpop.permute.xlu1 %1032 }
 0x6f3   :  { %v1523_v33 = vpop.eup %1522 }
 0x6f4   :  { %v825_v36 = vsel %vm174_vm2, %v1523_v33, 0.0 }
 0x707   :  { %v1858_v25 = vpop.f32.mrf.mxu1 }
 0x708   :  { %v704_v23 = vadd.f32 %v1841_v4, %v1858_v25 }
 0x709   :  { %v1413_v26 = vpop.f32.mrf.mxu1 }
 0x70b   :  { %v1860_v27 = vpop.f32.mrf.mxu1 }
 0x70d   :  { %v1414_v28 = vpop.f32.mrf.mxu1 }
 0x70f   :  { %v754_v29 = vpop.f32.mrf.mxu1 }
 0x710   :  { %v755_v30 = vadd.f32 %v754_v29, %v167_v10  ;;  %v707_v29 = vadd.f32 %v1844_v9, %v1860_v27 }
 0x711   :  { %v1425_v31 = vpop.f32.mrf.mxu1 }
 0x712   :  { %v810_v32 = vsel %vm174_vm2, %v755_v30, -inf }
 0x713   :  { %811 = vmax.xlane.f32.xlu0 %v810_v32  ;;  %v757_v34 = vpop.f32.mrf.mxu1 }
 0x715   :  { %v1426_v35 = vpop.f32.mrf.mxu1 }
 0x717   :  { %826 = vadd.xlane.f32.xlu0 %v825_v36 }
 0x79c   :  { %v812_v37 = vpop.xlane.xlu0 %811 }
 0x79d   :  { %v816_v38 = vsub.f32 %v755_v30, %v812_v37 }
 0x79f   :  { %v818_v39 = vmul.f32 1.442695, %v816_v38 }
 0x7a0   :  { %v827_v42 = vpop.xlane.xlu0 %826 }
 0x7a1   :  { %1524 = vpow2.f32 %v818_v39 }
 0x7a2   :  { %1526 = vrcp.f32 %v827_v42 }
 0x7ae   :  { %v1525_v40 = vpop.eup %1524 }
 0x7af   :  { %v822_v41 = vsel %vm174_vm2, %v1525_v40, 0.0  ;;  %v1527_v43 = vpop.eup %1526 }
 0x7b0   :  { %823 = vadd.xlane.f32.xlu0 %v822_v41  ;;  %v831_v45 = vmul.f32 %v1527_v43, %v1523_v33 }
 0x7b2   :  { %v833_v49 = vpack.c.bf16 %v831_v45, %v831_v45  ;;  %v1204_v45 = vld [vmem:[#allocation8 + $0xc] sm:$0xf] }
 0x7c6   :  { %882 = vrot.lane.b32.xlu0 %v1744_v12, %s1663_s24 }
 0x7ca   :  { %982 = vrot.lane.b32.xlu0 %v1741_v8, %s1665_s26 }
 0x839   :  { %v824_v44 = vpop.xlane.xlu0 %823 }
 0x83a   :  { %1528 = vrcp.f32 %v824_v44 }
 0x83d   :  { %v883_v46 = vpop.permute.xlu0 %882 }
 0x83e   :  { %v888_v47 = vsel %vm299_vm4, %v883_v46, 0  ;;  %v1209_v46 = vsel %vm299_vm4, %v1204_v45, 0 }
 0x83f   :  { %1440 = vmatpush3.bf16.msra.mxu0 %v888_v47 }
 0x840   :  { %1451 = vmatprep.subr.bf16.mxu0 %v1654_v0 }
 0x841   :  { %v983_v53 = vpop.permute.xlu0 %982 }
 0x842   :  { %1442 = vmatmul.mubr.msk.bf16.vlgmr.msra.gmra.mxu0 %vm174_vm2, %v833_v49 }
 0x843   :  { %1452 = vmatpush3.bf16.xpose.msra.mxu0 %v990_v50  ;;  %1453 = vmatprep.mubr.msk.bf16.mxu0 %vm1655_vm0, %v1654_v0 }
 0x844   :  { %1463 = vmatprep.subr.bf16.mxu0 %v1654_v0 }
 0x847   :  { %v1529_v51 = vpop.eup %1528 }
 0x848   :  { %v830_v52 = vmul.f32 %v1529_v51, %v1525_v40 }
 0x84a   :  { %1454 = vmatmul.mubr.msk.bf16.vlgmr.msra.gmra.mxu0 %vm174_vm2, %v983_v53  ;;  %v832_v54 = vpack.c.bf16 %v830_v52, %v830_v52 }
 0x84b   :  { %1465 = vmatprep.mubr.msk.bf16.mxu0 %vm1655_vm0, %v1654_v0 }
 0x84c   :  { %1436 = vmatmul.mubr.msk.bf16.vlgmr.msra.gmra.mxu1 %vm174_vm2, %v832_v54 }
 0x84d   :  { %1447 = vmatprep.mubr.msk.bf16.mxu1 %vm1655_vm0, %v1654_v0  ;;  %1446 = vmatpush3.bf16.msra.mxu1 %v937_v56 }
 0x84e   :  { %1457 = vmatprep.subr.bf16.mxu1 %v1654_v0 }
 0x902   :  { %v924_v57 = vpop.f32.mrf.mxu0 }
 0x904   :  { %v1443_v58 = vpop.f32.mrf.mxu0 }
 0x906   :  { %v927_v60 = vpop.f32.mrf.mxu0 }
 0x908   :  { %v1444_v62 = vpop.f32.mrf.mxu0 }
 0x90a   :  { %v1026_v63 = vpop.f32.mrf.mxu0 }
 0x90b   :  { %v1027_v2 = vadd.f32 %v1026_v63, %v168_v61 }
 0x90c   :  { %v876_v3 = vpop.f32.mrf.mxu1  ;;  %v1455_v5 = vpop.f32.mrf.mxu0 }
 0x90d   :  { %v930_v6 = vpack.c.bf16 %v924_v57, %v876_v3  ;;  %v1082_v7 = vsel %vm174_vm2, %v1027_v2, -inf }
 0x90e   :  { %v1437_v10 = vpop.f32.mrf.mxu1  ;;  %1083 = vmax.xlane.f32.xlu0 %v1082_v7  ;;  %v1029_v11 = vpop.f32.mrf.mxu0 }
 0x90f   :  { %1448 = vmatmul.mubr.msk.bf16.vlgmr.msra.gmra.mxu1 %vm174_vm2, %v930_v6 }
 0x910   :  { %1458 = vmatpush3.bf16.xpose.msra.mxu1 %v1040_v13  ;;  %v879_v14 = vpop.f32.mrf.mxu1  ;;  %v1456_v15 = vpop.f32.mrf.mxu0  ;;  %1459 = vmatprep.mubr.msk.bf16.mxu1 %vm1655_vm0, %v1654_v0 }
 0x911   :  { %1469 = vmatprep.subr.bf16.mxu1 %v1654_v0 }
 0x912   :  { %v1438_v22 = vpop.f32.mrf.mxu1 }
 0x917   :  { %1460 = vmatmul.mubr.msk.bf16.vlgmr.msra.gmra.mxu1 %vm174_vm2, %v1033_v16 }
 0x918   :  { %1471 = vmatprep.mubr.msk.bf16.mxu1 %vm1655_vm0, %v1654_v0 }
 0x997   :  { %v1084_v17 = vpop.xlane.xlu0 %1083 }
 0x998   :  { %v1088_v18 = vsub.f32 %v1027_v2, %v1084_v17 }
 0x99a   :  { %v1090_v19 = vmul.f32 1.442695, %v1088_v18 }
 0x99c   :  { %1530 = vpow2.f32 %v1090_v19 }
 0x9a9   :  { %v1531_v20 = vpop.eup %1530 }
 0x9aa   :  { %v1094_v21 = vsel %vm174_vm2, %v1531_v20, 0.0 }
 0x9ab   :  { %1095 = vadd.xlane.f32.xlu0 %v1094_v21 }
 0x9cf   :  { %v973_v24 = vpop.f32.mrf.mxu1 }
 0x9d0   :  { %v980_v26 = vadd.f32 %v973_v24, %v704_v23 }
 0x9d1   :  { %v1449_v28 = vpop.f32.mrf.mxu1 }
 0x9d3   :  { %v976_v30 = vpop.f32.mrf.mxu1 }
 0x9d4   :  { %v981_v31 = vadd.f32 %v976_v30, %v707_v29 }
 0x9d5   :  { %v1450_v32 = vpop.f32.mrf.mxu1 }
 0x9d7   :  { %v1076_v33 = vpop.f32.mrf.mxu1 }
 0x9d8   :  { %v1077_v34 = vadd.f32 %v1076_v33, %v168_v61  ;;  %v1309_v61 = vld [vmem:[%s1928_s5] ss:$0 sm:$0xff] }
 0x9d9   :  { %v1461_v35 = vpop.f32.mrf.mxu1 }
 0x9da   :  { %v1085_v36 = vsel %vm174_vm2, %v1077_v34, -inf }
 0x9db   :  { %1086 = vmax.xlane.f32.xlu1 %v1085_v36  ;;  %v1079_v37 = vpop.f32.mrf.mxu1 }
 0x9dd   :  { %v1462_v38 = vpop.f32.mrf.mxu1 }
 0x9ec   :  { %1106 = vrot.lane.b32.xlu1 %v1741_v8, %s1666_s27 }
 0xa34   :  { %v1096_v4 = vpop.xlane.xlu0 %1095 }
 0xa35   :  { %1532 = vrcp.f32 %v1096_v4 }
 0xa42   :  { %v1533_v25 = vpop.eup %1532 }
 0xa43   :  { %v1102_v27 = vmul.f32 %v1533_v25, %v1531_v20 }
 0xa45   :  { %v1104_v43 = vpack.c.bf16 %v1102_v27, %v1102_v27 }
 0xa64   :  { %v1087_v39 = vpop.xlane.xlu1 %1086 }
 0xa65   :  { %v1089_v40 = vsub.f32 %v1077_v34, %v1087_v39 }
 0xa67   :  { %v1092_v9 = vmul.f32 1.442695, %v1089_v40 }
 0xa68   :  { %v1107_v41 = vpop.permute.xlu1 %1106 }
 0xa69   :  { %1534 = vpow2.f32 %v1092_v9  ;;  %v1112_v42 = vsel %vm299_vm4, %v1107_v41, 0 }
 0xa6a   :  { %1464 = vmatpush3.bf16.msra.mxu0 %v1112_v42 }
 0xa6b   :  { %1475 = vmatprep.subr.bf16.mxu0 %v1654_v0 }
 0xa6d   :  { %1466 = vmatmul.mubr.msk.bf16.vlgmr.msra.gmra.mxu0 %vm174_vm2, %v1104_v43 }
 0xa6e   :  { %1477 = vmatprep.mubr.msk.bf16.mxu0 %vm1655_vm0, %v1654_v0  ;;  %1476 = vmatpush3.bf16.msra.mxu0 %v1209_v46 }
 0xa76   :  { %v1535_v8 = vpop.eup %1534 }
 0xa77   :  { %v1097_v44 = vsel %vm174_vm2, %v1535_v8, 0.0 }
 0xa78   :  { %1098 = vadd.xlane.f32.xlu0 %v1097_v44 }
 0xa8e   :  { %1154 = vrot.lane.b32.xlu0 %v1744_v12, %s1666_s27 }
 0xb01   :  { %v1099_v47 = vpop.xlane.xlu0 %1098 }
 0xb02   :  { %1536 = vrcp.f32 %v1099_v47 }
 0xb05   :  { %v1155_v48 = vpop.permute.xlu0 %1154 }
 0xb06   :  { %v1160_v49 = vsel %vm299_vm4, %v1155_v48, 0 }
 0xb07   :  { %1470 = vmatpush3.bf16.msra.mxu1 %v1160_v49 }
 0xb0f   :  { %v1537_v50 = vpop.eup %1536 }
 0xb10   :  { %v1103_v51 = vmul.f32 %v1537_v50, %v1535_v8 }
 0xb12   :  { %v1105_v52 = vpack.c.bf16 %v1103_v51, %v1103_v51 }
 0xb14   :  { %1472 = vmatmul.mubr.msk.bf16.vlgmr.msra.gmra.mxu1 %vm174_vm2, %v1105_v52 }
 0xb2d   :  { %v1148_v0 = vpop.f32.mrf.mxu0 }
 0xb2f   :  { %v1467_v53 = vpop.f32.mrf.mxu0 }
 0xb31   :  { %v1151_v54 = vpop.f32.mrf.mxu0 }
 0xb33   :  { %v1468_v55 = vpop.f32.mrf.mxu0 }
 0xbd4   :  { %v1196_v12 = vpop.f32.mrf.mxu1 }
 0xbd5   :  { %v1202_v56 = vpack.c.bf16 %v1196_v12, %v1148_v0 }
 0xbd6   :  { %v1473_v57 = vpop.f32.mrf.mxu1 }
 0xbd7   :  { %1478 = vmatmul.mubr.msk.bf16.vlgmr.msra.gmra.mxu0 %vm174_vm2, %v1202_v56 }
 0xbd8   :  { %v1199_v58 = vpop.f32.mrf.mxu1 }
 0xbda   :  { %v1474_v59 = vpop.f32.mrf.mxu1 }
 0xc97   :  { %v1245_v60 = vpop.f32.mrf.mxu0 }
 0xc98   :  { %v1252_v62 = vadd.f32 %v1245_v60, %v980_v26 }
 0xc99   :  { %v1479_v63 = vpop.f32.mrf.mxu0 }
 0xc9a   :  { %v1261_v1 = vadd.f32 %v1309_v61, %v1252_v62 }
 0xc9b   :  { %v1248_v2 = vpop.f32.mrf.mxu0 }
 0xc9c   :  { %1263 = vst.msk [vmem:[#allocation10] sm:$0xff] %vm110_vm1, %v1261_v1  ;;  %v1253_v3 = vadd.f32 %v1248_v2, %v981_v31 }
 0xc9d   :  { %v1480_v5 = vpop.f32.mrf.mxu0 }
 0xc9e   :  { %v1262_v6 = vadd.f32 %v1309_v61, %v1253_v3 }
 0xca0   :  { %1264 = vst.msk [vmem:[#allocation10 + $0x8] sm:$0xff] %vm110_vm1, %v1262_v6 }
 0xca1   :  { %1629 = shalt.err (!%p1626_p10)
}
 0xca2   :  { %1276 = dma.vmem_to_hbm [thread:$0]  %s1271_s7, 256, %s1929_s6, [#allocation4], %s1651_s1, %s1651_s1, %s1652_s12  }
 0xca3   :  { %1644 = dma.done.wait [#allocation4], 256  }
 0xca4   :  { %1645 = vsyncadd [#allocation4], 4294967040 }
 0xca5   :  { %1280 = vsyncpa [#allocation3], 1 }
 0xca6   :  { %1281 = vsyncpa [#allocation6], 1 }
 0xca7   :  { %1282 = vsyncpa [#allocation9], 1 }
 0xca8   :  { %1283 = vsyncpa [#allocation4], 1 }

</bundles_post_ra>
